<compile_context>
chip_gen: v6e
topology: v6e:2x2x1
jax: 0.10.0
libtpu: 0.0.40
codegen_flags: <defaults>
</compile_context>

<pallas_src>
import functools

import jax
import jax.numpy as jnp
from jax import lax
from jax.experimental import pallas as pl
from jax.experimental.pallas import tpu as pltpu


# --------------------------------------------------------------------------- #
# Kernel 1: K / V projection of the encoder states                            #
# --------------------------------------------------------------------------- #
def _kv_proj_kernel(kv_ref, wk_ref, wv_ref, k_ref, v_ref):
    # kv_ref: (tkv, D) encoder-token tile; wk/wv: (D, H*dk) resident weights.
    x = kv_ref[...]
    k_ref[...] = jnp.dot(x, wk_ref[...],
                         preferred_element_type=jnp.float32).astype(k_ref.dtype)
    v_ref[...] = jnp.dot(x, wv_ref[...],
                         preferred_element_type=jnp.float32).astype(v_ref.dtype)


# --------------------------------------------------------------------------- #
# Kernel 2: fused RMSNorm + cross attention + output proj + residual          #
# --------------------------------------------------------------------------- #
def _cross_attn_kernel(x_ref, lnw_ref, wq_ref, wo_ref, k_ref, v_ref, bias_ref,
                       o_ref, *, eps, n_heads, d_kv):
    # x_ref:    (tq, D)       decoder hidden-state tile (model dtype)
    # lnw_ref:  (1, D)        T5 layernorm scale (f32, cast hoisted to wrapper)
    # wq_ref:   (D, H*dk)     query projection (all heads, one wide matmul)
    # wo_ref:   (H*dk, D)     output projection (all heads, one wide matmul)
    # k_ref:    (H, K, dk)    projected keys for this batch element
    # v_ref:    (H, K, dk)    projected values for this batch element
    # bias_ref: (H, tq, K)    position bias (mask already folded in, f32)
    x = x_ref[...]
    x32 = x.astype(jnp.float32)

    # T5 "RMS" layer norm: stats in f32, no mean subtraction, no bias.
    var = jnp.mean(x32 * x32, axis=-1, keepdims=True)
    norm = (lnw_ref[...] * (x32 * lax.rsqrt(var + eps))).astype(x.dtype)

    # Q projection for ALL heads at once: (tq, D) @ (D, H*dk), f32 accumulation.
    q_all = jnp.dot(norm, wq_ref[...],
                    preferred_element_type=jnp.float32).astype(x.dtype)

    ctx_heads = []
    for h in range(n_heads):  # static unroll; only attention stays per-head
        q_h = q_all[:, h * d_kv:(h + 1) * d_kv]                 # (tq, dk)
        k_h = k_ref[h]                                           # (K, dk)
        v_h = v_ref[h]                                           # (K, dk)

        # scores = q @ k^T  (T5 has NO 1/sqrt(d_kv) scaling)
        s = lax.dot_general(q_h, k_h, (((1,), (1,)), ((), ())),
                            preferred_element_type=jnp.float32)  # (tq, K)
        s = s + bias_ref[h]

        # softmax in f32 (matches torch softmax(scores.float())), cast back.
        s = s - jnp.max(s, axis=-1, keepdims=True)
        p = jnp.exp(s)
        w = (p / jnp.sum(p, axis=-1, keepdims=True)).astype(v_h.dtype)

        ctx_heads.append(jnp.dot(w, v_h,
                                 preferred_element_type=jnp.float32))  # (tq, dk)

    # Concatenate heads (lane concat, XLU) and do ONE wide output projection.
    ctx = jnp.concatenate(ctx_heads, axis=-1).astype(x.dtype)     # (tq, H*dk)
    y = jnp.dot(ctx, wo_ref[...], preferred_element_type=jnp.float32)  # (tq, D)

    # residual add (dropout = identity in eval mode)
    o_ref[...] = (x32 + y).astype(o_ref.dtype)


# --------------------------------------------------------------------------- #
# Wrapper                                                                      #
# --------------------------------------------------------------------------- #
def t5_layer_cross_attention(hidden_states, kv, ln_weight, wq, wk, wv, wo,
                             position_bias, *, n_heads, eps=1e-6,
                             tq=None, tkv=None):
    """hidden_states: (B,Q,D); kv: (B,K,D); ln_weight: (D,);
    wq/wk/wv: (D, H*dk); wo: (H*dk, D); position_bias broadcastable to (B,H,Q,K)."""
    B, Q, D = hidden_states.shape
    K = kv.shape[1]
    HD = wq.shape[1]
    assert HD % n_heads == 0
    dk = HD // n_heads
    dtype = hidden_states.dtype
    itemsize = jnp.dtype(dtype).itemsize

    # ------------------- kernel 1: K/V projection ------------------------- #
    BK = B * K
    if tkv is None:
        tkv = BK if BK <= 256 else 256
    assert BK % tkv == 0, "B*K must be divisible by the encoder-token tile"
    kv_flat = kv.reshape(BK, D)

    kv_cost = pl.CostEstimate(
        flops=2 * 2 * BK * D * HD,
        transcendentals=0,
        bytes_accessed=(kv_flat.size + wk.size + wv.size + 2 * BK * HD) * itemsize)

    k_flat, v_flat = pl.pallas_call(
        _kv_proj_kernel,
        out_shape=(jax.ShapeDtypeStruct((BK, HD), dtype),
                   jax.ShapeDtypeStruct((BK, HD), dtype)),
        grid_spec=pltpu.PrefetchScalarGridSpec(
            num_scalar_prefetch=0,
            grid=(BK // tkv,),
            in_specs=[
                pl.BlockSpec((tkv, D), lambda i: (i, 0)),   # encoder-token tile
                pl.BlockSpec((D, HD), lambda i: (0, 0)),    # wk (constant block)
                pl.BlockSpec((D, HD), lambda i: (0, 0)),    # wv (constant block)
            ],
            out_specs=(pl.BlockSpec((tkv, HD), lambda i: (i, 0)),
                       pl.BlockSpec((tkv, HD), lambda i: (i, 0))),
        ),
        compiler_params=pltpu.CompilerParams(
            dimension_semantics=("parallel",),
            vmem_limit_bytes=64 * 1024 * 1024),
        cost_estimate=kv_cost,
    )(kv_flat, wk, wv)

    # Head-major K/V so the attention kernel's per-head work is plain 2-D matmuls
    # (single XLA transpose in HBM, amortized over all q tiles).
    k_heads = k_flat.reshape(B, K, n_heads, dk).transpose(0, 2, 1, 3)   # (B,H,K,dk)
    v_heads = v_flat.reshape(B, K, n_heads, dk).transpose(0, 2, 1, 3)   # (B,H,K,dk)
    lnw = ln_weight.reshape(1, D).astype(jnp.float32)                   # cast hoisted
    bias = jnp.broadcast_to(position_bias, (B, n_heads, Q, K)).astype(jnp.float32)

    # ------------------- kernel 2: fused attention ------------------------ #
    if tq is None:
        tq = Q if Q <= 256 else 256
    assert Q % tq == 0, "query length must be divisible by the q tile"

    attn_cost = pl.CostEstimate(
        flops=2 * B * Q * (D * HD + 2 * K * HD + HD * D),
        transcendentals=B * n_heads * Q * K,
        bytes_accessed=(2 * hidden_states.size + k_heads.size + v_heads.size
                        + wq.size + wo.size + lnw.size + bias.size) * itemsize)

    out = pl.pallas_call(
        functools.partial(_cross_attn_kernel, eps=eps, n_heads=n_heads, d_kv=dk),
        out_shape=jax.ShapeDtypeStruct((B, Q, D), dtype),
        grid_spec=pltpu.PrefetchScalarGridSpec(
            num_scalar_prefetch=0,
            grid=(B, Q // tq),
            in_specs=[
                pl.BlockSpec((None, tq, D), lambda b, i: (b, i, 0)),          # x tile
                pl.BlockSpec((1, D), lambda b, i: (0, 0)),                    # ln scale
                pl.BlockSpec((D, HD), lambda b, i: (0, 0)),                   # wq
                pl.BlockSpec((HD, D), lambda b, i: (0, 0)),                   # wo
                pl.BlockSpec((None, n_heads, K, dk), lambda b, i: (b, 0, 0, 0)),  # K
                pl.BlockSpec((None, n_heads, K, dk), lambda b, i: (b, 0, 0, 0)),  # V
                pl.BlockSpec((None, n_heads, tq, K), lambda b, i: (b, 0, i, 0)),  # bias
            ],
            out_specs=pl.BlockSpec((None, tq, D), lambda b, i: (b, i, 0)),
        ),
        compiler_params=pltpu.CompilerParams(
            dimension_semantics=("parallel", "parallel"),
            vmem_limit_bytes=64 * 1024 * 1024),
        cost_estimate=attn_cost,
    )(hidden_states, lnw, wq, wo, k_heads, v_heads, bias)

    return out


# --------------------------------------------------------------------------- #
# Pure-JAX reference                                                           #
# --------------------------------------------------------------------------- #
def reference_t5_layer_cross_attention(hidden_states, kv, ln_weight, wq, wk, wv,
                                       wo, position_bias, *, n_heads, eps=1e-6):
    B, Q, D = hidden_states.shape
    K = kv.shape[1]
    HD = wq.shape[1]
    dk = HD // n_heads
    x32 = hidden_states.astype(jnp.float32)
    var = jnp.mean(x32 * x32, axis=-1, keepdims=True)
    norm = (ln_weight * (x32 / jnp.sqrt(var + eps))).astype(hidden_states.dtype)
    q = (norm @ wq).reshape(B, Q, n_heads, dk).transpose(0, 2, 1, 3)
    k = (kv @ wk).reshape(B, K, n_heads, dk).transpose(0, 2, 1, 3)
    v = (kv @ wv).reshape(B, K, n_heads, dk).transpose(0, 2, 1, 3)
    scores = jnp.einsum('bhqd,bhkd->bhqk', q, k) + position_bias
    weights = jax.nn.softmax(scores.astype(jnp.float32), axis=-1).astype(scores.dtype)
    ctx = jnp.einsum('bhqk,bhkd->bhqd', weights, v)
    ctx = ctx.transpose(0, 2, 1, 3).reshape(B, Q, HD)
    y = ctx @ wo
    return hidden_states + y


if __name__ == "__main__":
    # Small T5-like config: d_model=32, n_heads=4, d_kv=8, qlen=8, klen=16.
    B, Q, K, D, H, dkv = 2, 8, 16, 32, 4, 8
    HD = H * dkv
    eps = 1e-6

    key = jax.random.PRNGKey(0)
    k1, k2, k3, k4, k5, k6 = jax.random.split(key, 6)

    hidden_states = jax.random.normal(k1, (B, Q, D), dtype=jnp.float32)
    kv = jax.random.normal(k2, (B, K, D), dtype=jnp.float32)
    # nn.Linear(in, out, bias=False) weight is (out, in); we store the transpose
    # (in, out) so the kernels do x @ W directly.
    wq = jax.random.normal(k3, (D, HD), dtype=jnp.float32) * 0.05
    wk = jax.random.normal(k4, (D, HD), dtype=jnp.float32) * 0.05
    wv = jax.random.normal(k5, (D, HD), dtype=jnp.float32) * 0.05
    wo = jax.random.normal(k6, (HD, D), dtype=jnp.float32) * 0.05
    ln_weight = jnp.ones((D,), dtype=jnp.float32)  # T5LayerNorm init = ones

    # Cross-attention mask folded into position_bias (as the caller of the torch
    # module would): 0 for valid encoder tokens, -1e9 for padding.
    valid_lens = jnp.array([K, K - 4])
    key_mask = jnp.arange(K)[None, :] < valid_lens[:, None]          # (B, K)
    position_bias = jnp.where(key_mask, 0.0, -1e9).astype(jnp.float32)
    position_bias = position_bias[:, None, None, :]                  # (B,1,1,K)

    out = t5_layer_cross_attention(hidden_states, kv, ln_weight, wq, wk, wv, wo,
                                   position_bias, n_heads=H, eps=eps)
    out = jax.block_until_ready(out)

    ref = reference_t5_layer_cross_attention(hidden_states, kv, ln_weight, wq, wk,
                                             wv, wo, position_bias,
                                             n_heads=H, eps=eps)
    assert out.shape == (B, Q, D)
    assert jnp.allclose(out, ref, atol=1e-4, rtol=1e-4), "mismatch vs reference"

    print("KERNEL_OK")
</pallas_src>

<mosaic_0001>
module attributes {stable_mosaic.version = 11 : i64} {
  func.func @_kv_proj_kernel(%arg0: i32, %arg1: memref<32x32xf32, #tpu.memory_space<vmem>>, %arg2: memref<32x32xf32, #tpu.memory_space<vmem>>, %arg3: memref<32x32xf32, #tpu.memory_space<vmem>>, %arg4: memref<32x32xf32, #tpu.memory_space<vmem>>, %arg5: memref<32x32xf32, #tpu.memory_space<vmem>>) attributes {dimension_semantics = [#tpu.dimension_semantics<parallel>], iteration_bounds = array<i64: 1>, scalar_prefetch = 0 : i64, scratch_operands = 0 : i64, tpu.core_type = #tpu.core_type<tc>, window_params = [{transform_indices = @transform_0, window_bounds = array<i64: 32, 32>}, {pipeline_mode = #tpu.pipeline_mode<synchronous>, transform_indices = @transform_1, window_bounds = array<i64: 32, 32>}, {pipeline_mode = #tpu.pipeline_mode<synchronous>, transform_indices = @transform_2, window_bounds = array<i64: 32, 32>}, {transform_indices = @transform_3, window_bounds = array<i64: 32, 32>}, {transform_indices = @transform_4, window_bounds = array<i64: 32, 32>}]} {
    %c0 = arith.constant 0 : index
    %c0_0 = arith.constant 0 : index
    %0 = vector.load %arg1[%c0, %c0_0] : memref<32x32xf32, #tpu.memory_space<vmem>>, vector<32x32xf32>
    %c0_1 = arith.constant 0 : index
    %c0_2 = arith.constant 0 : index
    %1 = vector.load %arg2[%c0_1, %c0_2] : memref<32x32xf32, #tpu.memory_space<vmem>>, vector<32x32xf32>
    %cst = arith.constant dense<0.000000e+00> : vector<32x32xf32>
    %2 = tpu.matmul %0, %1, %cst {dimension_numbers = #tpu.dot_dimension_numbers<[1], [0], [0], [1], [0, 0, 1, 1], [], []>} : vector<32x32xf32>, vector<32x32xf32>, vector<32x32xf32> -> vector<32x32xf32>
    %c0_3 = arith.constant 0 : index
    %c0_4 = arith.constant 0 : index
    %3 = vector.load %arg4[%c0_3, %c0_4] : memref<32x32xf32, #tpu.memory_space<vmem>>, vector<32x32xf32>
    tpu.vector_store %arg4[%c0_3, %c0_4], %2 {strides = array<i32>} : memref<32x32xf32, #tpu.memory_space<vmem>>, vector<32x32xf32>,
    %c0_5 = arith.constant 0 : index
    %c0_6 = arith.constant 0 : index
    %4 = vector.load %arg3[%c0_5, %c0_6] : memref<32x32xf32, #tpu.memory_space<vmem>>, vector<32x32xf32>
    %cst_7 = arith.constant dense<0.000000e+00> : vector<32x32xf32>
    %5 = tpu.matmul %0, %4, %cst_7 {dimension_numbers = #tpu.dot_dimension_numbers<[1], [0], [0], [1], [0, 0, 1, 1], [], []>} : vector<32x32xf32>, vector<32x32xf32>, vector<32x32xf32> -> vector<32x32xf32>
    %c0_8 = arith.constant 0 : index
    %c0_9 = arith.constant 0 : index
    %6 = vector.load %arg5[%c0_8, %c0_9] : memref<32x32xf32, #tpu.memory_space<vmem>>, vector<32x32xf32>
    tpu.vector_store %arg5[%c0_8, %c0_9], %5 {strides = array<i32>} : memref<32x32xf32, #tpu.memory_space<vmem>>, vector<32x32xf32>,
    return
  }
  func.func @transform_0(%arg0: i32) -> (i32, i32) {
    %c0_i32 = arith.constant 0 : i32
    %c0_i32_0 = arith.constant 0 : i32
    return %arg0, %c0_i32 : i32, i32
  }
  func.func @transform_1(%arg0: i32) -> (i32, i32) {
    %c0_i32 = arith.constant 0 : i32
    %c0_i32_0 = arith.constant 0 : i32
    %c0_i32_1 = arith.constant 0 : i32
    return %c0_i32, %c0_i32_0 : i32, i32
  }
  func.func @transform_2(%arg0: i32) -> (i32, i32) {
    %c0_i32 = arith.constant 0 : i32
    %c0_i32_0 = arith.constant 0 : i32
    %c0_i32_1 = arith.constant 0 : i32
    return %c0_i32, %c0_i32_0 : i32, i32
  }
  func.func @transform_3(%arg0: i32) -> (i32, i32) {
    %c0_i32 = arith.constant 0 : i32
    %c0_i32_0 = arith.constant 0 : i32
    return %arg0, %c0_i32 : i32, i32
  }
  func.func @transform_4(%arg0: i32) -> (i32, i32) {
    %c0_i32 = arith.constant 0 : i32
    %c0_i32_0 = arith.constant 0 : i32
    return %arg0, %c0_i32 : i32, i32
  }
}

</mosaic_0001>

<bundles_post_ra>
// kernel: tpu_custom_call.1
= control target key start
LH: loop header
LB: loop body
LE: loop exit
PB: predicated region body
PF: predicated region fallthrough
CT: control target
= control target key end

     0   :  { %10 = vsyncpa [#allocation3], 0  ;;  %s541_s0 = inlined_call_operand.hbm [shape: f32[32,32], index: 0, kind: input, shape index: {}]   ;;  %s542_s1 = inlined_call_operand.hbm [shape: f32[32,32], index: 1, kind: input, shape index: {}]   ;;  %s543_s2 = inlined_call_operand.hbm [shape: f32[32,32], index: 2, kind: input, shape index: {}]   ;;  %s544_s3 = inlined_call_operand.hbm [shape: f32[32,32], index: 3, kind: output, shape index: {0}]   ;;  %s545_s4 = inlined_call_operand.hbm [shape: f32[32,32], index: 4, kind: output, shape index: {1}]  }
   0x1   :  { %11 = vsyncpa [#allocation6], 0 }
   0x2   :  { %12 = vsyncpa [#allocation4], 0 }
   0x3   :  { %13 = vsyncpa [#allocation10], 0  ;;  %s463_s15 = smov [#allocation5]   ;;  %s464_s17 = smov [#allocation2]  }
   0x4   :  { %s31_s16 = sshll.u32 %s463_s15, 4  ;;  %s19_s18 = sshll.u32 %s464_s17, 4  ;;  %s32_s16 = int_to_ptr.vmem [resolvable:$true] %s31_s16  ;;  %s20_s18 = int_to_ptr.vmem [resolvable:$true] %s19_s18 }
   0x5   :  { %s363_s19 = scalar_lea.vmem %s32_s16, 512  ;;  %p368_p1 = scmp.lt.s32.totalorder %s32_s16, %s32_s16 }
   0x6   :  { %p364_p0 = scmp.ne.s32.totalorder %s32_s16, %s363_s19  ;;  %p369_p2 = scmp.lt.s32.totalorder %s363_s19, %s363_s19 }
   0x8   :  { %p370_p3 = por %p369_p2, %p368_p1 }
   0xa   :  { %p371_p4 = pnand %p370_p3, %p364_p0 }
   0xc   :  { %374 = shalt.err (!%p371_p4)
}
   0xd   :  { %s465_s20 = smov 128   ;;  %s466_s21 = smov 8  }
   0xe   :  { %37 = dma.hbm_to_vmem [thread:$0]  %s542_s1, 512, %s32_s16, [#allocation6], %s465_s20, %s465_s20, %s466_s21  }
   0xf   :  { %s383_s24 = scalar_lea.vmem %s20_s18, 512  ;;  %p388_p6 = scmp.lt.s32.totalorder %s20_s18, %s20_s18 }
  0x10   :  { %p384_p5 = scmp.ne.s32.totalorder %s20_s18, %s383_s24  ;;  %p389_p7 = scmp.lt.s32.totalorder %s383_s24, %s383_s24 }
  0x12   :  { %p390_p8 = por %p389_p7, %p388_p6 }
  0x14   :  { %p391_p9 = pnand %p390_p8, %p384_p5 }
  0x16   :  { %394 = shalt.err (!%p391_p9)
}
  0x17   :  { %25 = dma.hbm_to_vmem [thread:$0]  %s541_s0, 512, %s20_s18, [#allocation3], %s465_s20, %s465_s20, %s466_s21  }
  0x18   :  { %s467_s27 = smov [#allocation7]  }
  0x19   :  { %s43_s28 = sshll.u32 %s467_s27, 4  ;;  %s44_s28 = int_to_ptr.vmem [resolvable:$true] %s43_s28 }
  0x1a   :  { %s403_s29 = scalar_lea.vmem %s44_s28, 512  ;;  %p408_p11 = scmp.lt.s32.totalorder %s44_s28, %s44_s28 }
  0x1b   :  { %p404_p10 = scmp.ne.s32.totalorder %s44_s28, %s403_s29  ;;  %p409_p12 = scmp.lt.s32.totalorder %s403_s29, %s403_s29 }
  0x1d   :  { %p410_p13 = por %p409_p12, %p408_p11 }
  0x1f   :  { %p411_p0 = pnand %p410_p13, %p404_p10 }
  0x21   :  { %414 = shalt.err (!%p411_p0)
}
  0x22   :  { %49 = dma.hbm_to_vmem [thread:$0]  %s543_s2, 512, %s44_s28, [#allocation6], %s465_s20, %s465_s20, %s466_s21  }
  0x23   :  { %455 = dma.done.wait [#allocation3], 512  }
  0x24   :  { %456 = vsyncadd [#allocation3], 4294966784 }
  0x25   :  { %457 = dma.done.wait [#allocation6], 1024  }
  0x26   :  { %458 = vsyncadd [#allocation6], 4294966272  ;;  %v66_v0 = vld [vmem:[#allocation5 + $0x18] sm:$0xff]  ;;  %v65_v2 = vld [vmem:[#allocation5 + $0x10] sm:$0xff]  ;;  %vm67_vm0 = vcmask 261120   ;;  %s468_s0 = smov [#allocation8]  }
  0x27   :  { %v172_v1 = vld [vmem:[#allocation7 + $0x18] sm:$0xff]  ;;  %320 = vmatprep.subr.mxu0 %v66_v0  ;;  %v171_v3 = vld [vmem:[#allocation7 + $0x10] sm:$0xff]  ;;  %v64_v4 = vld [vmem:[#allocation5 + $0x8] sm:$0xff]  ;;  %s267_s2 = sshll.u32 %s468_s0, 4  ;;  %s469_s5 = smov [#allocation9]   ;;  %s268_s2 = int_to_ptr.vmem [resolvable:$true] %s267_s2 }
  0x28   :  { %334 = vmatprep.subr.mxu1 %v172_v1  ;;  %321 = vmatpush3.msra.mxu0 %v66_v0  ;;  %v170_v5 = vld [vmem:[#allocation7 + $0x8] sm:$0xff]  ;;  %v63_v6 = vld [vmem:[#allocation5] sm:$0xff]  ;;  %v61_v10 = vld [vmem:[#allocation2 + $0x10] sm:$0xff]  ;;  %s279_s6 = sshll.u32 %s469_s5, 4  ;;  %s415_s7 = scalar_lea.vmem %s268_s2, 512  ;;  %s280_s6 = int_to_ptr.vmem [resolvable:$true] %s279_s6 }
  0x29   :  { %335 = vmatpush3.msra.mxu1 %v172_v1  ;;  %322 = vmatprep.subr.mxu0 %v65_v2  ;;  %v169_v7 = vld [vmem:[#allocation7] sm:$0xff]  ;;  %v60_v9 = vld [vmem:[#allocation2 + $0x8] sm:$0xff]  ;;  %v62_v11 = vld [vmem:[#allocation2 + $0x18] sm:$0xff]  ;;  %p416_p1 = scmp.ne.s32.totalorder %s268_s2, %s415_s7  ;;  %p420_p2 = scmp.lt.s32.totalorder %s268_s2, %s268_s2 }
  0x2a   :  { %336 = vmatprep.subr.mxu1 %v171_v3  ;;  %323 = vmatpush3.msra.mxu0 %v65_v2  ;;  %v59_v8 = vld [vmem:[#allocation2] sm:$0xff]  ;;  %p421_p3 = scmp.lt.s32.totalorder %s415_s7, %s415_s7 }
  0x2b   :  { %337 = vmatpush3.msra.mxu1 %v171_v3  ;;  %324 = vmatprep.subr.mxu0 %v64_v4 }
  0x2c   :  { %338 = vmatprep.subr.mxu1 %v170_v5  ;;  %325 = vmatpush3.msra.mxu0 %v64_v4  ;;  %p422_p4 = por %p421_p3, %p420_p2 }
  0x2d   :  { %339 = vmatpush3.msra.mxu1 %v170_v5  ;;  %326 = vmatprep.subr.mxu0 %v63_v6 }
  0x2e   :  { %340 = vmatprep.subr.mxu1 %v169_v7  ;;  %327 = vmatpush3.msra.mxu0 %v63_v6  ;;  %p423_p5 = pnand %p422_p4, %p416_p1 }
  0x2f   :  { %328 = vmatprep.mubr.msk.f32.mxu0 %vm67_vm0, %v59_v8  ;;  %341 = vmatpush3.msra.mxu1 %v169_v7 }
  0x30   :  { %342 = vmatprep.mubr.msk.f32.mxu1 %vm67_vm0, %v59_v8  ;;  %329 = vmatmul.mubr.msk.f32.vlgmr.msra.gmra.mxu0 %vm67_vm0, %v60_v9 }
  0x31   :  { %343 = vmatmul.mubr.msk.f32.vlgmr.msra.gmra.mxu1 %vm67_vm0, %v60_v9  ;;  %331 = vmatprep.mubr.msk.f32.mxu0 %vm67_vm0, %v61_v10 }
  0x32   :  { %345 = vmatprep.mubr.msk.f32.mxu1 %vm67_vm0, %v61_v10 }
  0x34   :  { %332 = vmatmul.mubr.msk.f32.gmra.mxu0 %vm67_vm0, %v62_v11 }
  0x35   :  { %346 = vmatmul.mubr.msk.f32.gmra.mxu1 %vm67_vm0, %v62_v11 }
  0xf0   :  { %v330_v12 = vpop.f32.mrf.mxu0 }
  0xf1   :  { %v344_v13 = vpop.f32.mrf.mxu1  ;;  %166 = vst.msk [vmem:[#allocation8 + $0x8] sm:$0xff] %vm67_vm0, %v330_v12 }
  0xf2   :  { %259 = vst.msk [vmem:[#allocation9 + $0x8] sm:$0xff] %vm67_vm0, %v344_v13  ;;  %v146_v14 = vpop.f32.mrf.mxu0 }
  0xf3   :  { %v239_v15 = vpop.f32.mrf.mxu1  ;;  %165 = vst.msk [vmem:[#allocation8] sm:$0xff] %vm67_vm0, %v146_v14 }
  0xf4   :  { %258 = vst.msk [vmem:[#allocation9] sm:$0xff] %vm67_vm0, %v239_v15  ;;  %v333_v16 = vpop.f32.mrf.mxu0 }
  0xf5   :  { %v347_v17 = vpop.f32.mrf.mxu1  ;;  %168 = vst.msk [vmem:[#allocation8 + $0x18] sm:$0xff] %vm67_vm0, %v333_v16 }
  0xf6   :  { %261 = vst.msk [vmem:[#allocation9 + $0x18] sm:$0xff] %vm67_vm0, %v347_v17  ;;  %v156_v18 = vpop.f32.mrf.mxu0 }
  0xf7   :  { %v249_v19 = vpop.f32.mrf.mxu1  ;;  %167 = vst.msk [vmem:[#allocation8 + $0x10] sm:$0xff] %vm67_vm0, %v156_v18 }
  0xf8   :  { %260 = vst.msk [vmem:[#allocation9 + $0x10] sm:$0xff] %vm67_vm0, %v249_v19 }
  0xf9   :  { %426 = shalt.err (!%p423_p5)
}
  0xfa   :  { %273 = dma.vmem_to_hbm [thread:$0]  %s268_s2, 512, %s544_s3, [#allocation4], %s465_s20, %s465_s20, %s466_s21  }
  0xfb   :  { %s435_s10 = scalar_lea.vmem %s280_s6, 512  ;;  %p440_p7 = scmp.lt.s32.totalorder %s280_s6, %s280_s6 }
  0xfc   :  { %p436_p6 = scmp.ne.s32.totalorder %s280_s6, %s435_s10  ;;  %p441_p8 = scmp.lt.s32.totalorder %s435_s10, %s435_s10 }
  0xfe   :  { %p442_p9 = por %p441_p8, %p440_p7 }
 0x100   :  { %p443_p10 = pnand %p442_p9, %p436_p6 }
 0x102   :  { %446 = shalt.err (!%p443_p10)
}
 0x103   :  { %285 = dma.vmem_to_hbm [thread:$0]  %s280_s6, 512, %s545_s4, [#allocation10], %s465_s20, %s465_s20, %s466_s21  }
 0x104   :  { %459 = dma.done.wait [#allocation4], 512  }
 0x105   :  { %460 = vsyncadd [#allocation4], 4294966784 }
 0x106   :  { %461 = dma.done.wait [#allocation10], 512  }
 0x107   :  { %462 = vsyncadd [#allocation10], 4294966784 }
 0x108   :  { %292 = vsyncpa [#allocation3], 1 }
 0x109   :  { %293 = vsyncpa [#allocation6], 1 }
 0x10a   :  { %294 = vsyncpa [#allocation4], 1 }
 0x10b   :  { %295 = vsyncpa [#allocation10], 1 }

</bundles_post_ra>
